<compile_context>
chip_gen: v7x
topology: tpu7x:2x2x1
jax: 0.10.0
libtpu: 0.0.40
codegen_flags: <defaults>
</compile_context>

<pallas_src>
import numpy as np
import jax
import jax.numpy as jnp
from jax.experimental import pallas as pl
from jax.experimental.pallas import tpu as pltpu

_CDTYPE = jnp.bfloat16


def _default_vmem_limit():
    cap = 64 * 1024 * 1024  # conservative default (v7x physical VMEM)
    try:
        info = pltpu.get_tpu_info()
        cap = int(getattr(info, "vmem_capacity_bytes", cap))
    except Exception:
        pass
    return int(min(cap * 3 // 4, 96 * 1024 * 1024))


_VMEM_LIMIT = _default_vmem_limit()


def _pad128(c):
    return ((int(c) + 127) // 128) * 128


# ---------------------------------------------------------------------------
# Kernel 1: fused 3x3x3 conv (pad=1, stride=1, bias=False) + folded BN + ReLU
#           D-tiled with halo, manual HBM->VMEM DMA, fused zero padding,
#           optional fused channel-concat (multiple inputs + split weights).
# ---------------------------------------------------------------------------
def _make_conv_kernel(TD, H, W, cins, cout, num_dt):
    n_in = len(cins)
    KROWS = TD * H * W

    def kernel(*refs):
        x_hbm = refs[:n_in]                        # (N, D, H, W, Ci) in HBM/ANY
        w_refs = refs[n_in:2 * n_in]               # (27, Ci, Cout) bf16
        sb_ref = refs[2 * n_in]                    # (2, Cout) f32  (scale, bias)
        o_ref = refs[2 * n_in + 1]                 # (1, TD*H*W, Cout)
        xpads = refs[2 * n_in + 2:3 * n_in + 2]    # VMEM (TD+2, H+2, W, Ci)
        sem = refs[3 * n_in + 2]                   # DMA sems (n_in, 3)

        n = pl.program_id(0)
        dt = pl.program_id(1)
        d0 = dt * TD

        def main_copy(i):
            return pltpu.make_async_copy(
                x_hbm[i].at[n, pl.ds(d0, TD), :, :, :],
                xpads[i].at[pl.ds(1, TD), pl.ds(1, H), :, :],
                sem.at[i, 0])

        def lead_copy(i):
            return pltpu.make_async_copy(
                x_hbm[i].at[n, pl.ds(d0 - 1, 1), :, :, :],
                xpads[i].at[pl.ds(0, 1), pl.ds(1, H), :, :],
                sem.at[i, 1])

        def trail_copy(i):
            return pltpu.make_async_copy(
                x_hbm[i].at[n, pl.ds(d0 + TD, 1), :, :, :],
                xpads[i].at[pl.ds(TD + 1, 1), pl.ds(1, H), :, :],
                sem.at[i, 2])

        # Issue halo DMAs (fused SAME padding: pad frame only exists in VMEM).
        for i in range(n_in):
            main_copy(i).start()

            @pl.when(dt > 0)
            def _(i=i):
                lead_copy(i).start()

            @pl.when(dt < num_dt - 1)
            def _(i=i):
                trail_copy(i).start()

        # Zero the halo regions no DMA writes (disjoint from DMA targets,
        # leading-dim slices only -> plain stores).
        for i in range(n_in):
            xp = xpads[i]
            ci = cins[i]
            zrow = jnp.zeros((TD + 2, 1, W, ci), xp.dtype)
            xp[:, 0:1, :, :] = zrow
            xp[:, H + 1:H + 2, :, :] = zrow
            zslab = jnp.zeros((1, H + 2, W, ci), xp.dtype)

            @pl.when(dt == 0)
            def _(xp=xp, zslab=zslab):
                xp[0:1, :, :, :] = zslab

            @pl.when(dt == num_dt - 1)
            def _(xp=xp, zslab=zslab):
                xp[TD + 1:TD + 2, :, :, :] = zslab

        # Wait for the DMAs.
        for i in range(n_in):
            main_copy(i).wait()

            @pl.when(dt > 0)
            def _(i=i):
                lead_copy(i).wait()

            @pl.when(dt < num_dt - 1)
            def _(i=i):
                trail_copy(i).wait()

        # Compute: implicit-GEMM conv, 27 shifted-window matmuls (K = Ci) per
        # (logically channel-concatenated) input, f32 accumulation.
        acc = jnp.zeros((KROWS, cout), jnp.float32)
        for i in range(n_in):
            ci = cins[i]
            xin = xpads[i][...]                                    # (TD+2, H+2, W, ci)
            zc = jnp.zeros((TD + 2, H + 2, 1, ci), xin.dtype)
            x_m1 = jnp.concatenate([zc, xin[:, :, :W - 1, :]], axis=2)  # value at w-1
            x_p1 = jnp.concatenate([xin[:, :, 1:, :], zc], axis=2)      # value at w+1
            taps = (x_m1, xin, x_p1)
            for kd in range(3):
                for kh in range(3):
                    for kw in range(3):
                        xs_ = taps[kw][kd:kd + TD, kh:kh + H, :, :].reshape(KROWS, ci)
                        acc = acc + jax.lax.dot_general(
                            xs_, w_refs[i][kd * 9 + kh * 3 + kw],
                            dimension_numbers=(((1,), (0,)), ((), ())),
                            preferred_element_type=jnp.float32)

        y = acc * sb_ref[0:1, :] + sb_ref[1:2, :]
        y = jnp.maximum(y, 0.0)
        o_ref[0] = y.astype(o_ref.dtype)

    return kernel


def _pick_td(D, H, W, cins, cout, budget, max_td):
    if (H * W) % 8 != 0:
        return D                      # single full-D tile keeps BlockSpec legal
    cop = _pad128(cout)
    best = None
    for td in range(1, min(D, max_td) + 1):
        if D % td:
            continue
        rows = td * H * W
        xpads = sum((td + 2) * (H + 2) * W * _pad128(c) * 2 for c in cins)   # scratch
        live = max(3 * (td + 2) * (H + 2) * W * _pad128(c) * 2 for c in cins)  # xin/m1/p1
        accb = rows * cop * 4
        outb = 2 * rows * cop * 2
        wb = sum(27 * max(c, 16) * cop * 2 for c in cins)
        if xpads + live + accb + outb + wb <= budget:
            best = td
    return best if best is not None else 1


def conv3x3x3_bn_relu(xs, ws, scale, bias, *, max_td=8):
    """xs: list of (N,D,H,W,Ci) tensors (logically channel-concatenated);
       ws: list of (3,3,3,Ci,Cout); scale/bias: (Cout,). Returns (N,D,H,W,Cout)."""
    N, D, H, W, _ = xs[0].shape
    cins = tuple(int(x.shape[-1]) for x in xs)
    cout = int(ws[0].shape[-1])

    TD = _pick_td(D, H, W, cins, cout, _VMEM_LIMIT // 2, max_td)
    num_dt = D // TD

    w_slabs = [jnp.asarray(w, jnp.float32).reshape(27, c, cout).astype(_CDTYPE)
               for w, c in zip(ws, cins)]
    sb = jnp.stack([scale.astype(jnp.float32), bias.astype(jnp.float32)])  # (2, Cout)

    kernel = _make_conv_kernel(TD, H, W, cins, cout, num_dt)

    in_specs = ([pl.BlockSpec(memory_space=pl.ANY)] * len(xs)
                + [pl.BlockSpec((27, c, cout), lambda n, dt: (0, 0, 0)) for c in cins]
                + [pl.BlockSpec((2, cout), lambda n, dt: (0, 0))])
    out_specs = pl.BlockSpec((1, TD * H * W, cout), lambda n, dt: (n, dt, 0))
    scratch_shapes = ([pltpu.VMEM((TD + 2, H + 2, W, c), _CDTYPE) for c in cins]
                      + [pltpu.SemaphoreType.DMA((len(xs), 3))])

    out = pl.pallas_call(
        kernel,
        out_shape=jax.ShapeDtypeStruct((N, D * H * W, cout), _CDTYPE),
        grid_spec=pltpu.PrefetchScalarGridSpec(
            num_scalar_prefetch=0,
            grid=(N, num_dt),
            in_specs=in_specs,
            out_specs=out_specs,
            scratch_shapes=scratch_shapes),
        compiler_params=pltpu.CompilerParams(
            dimension_semantics=("parallel", "parallel"),
            vmem_limit_bytes=_VMEM_LIMIT),
    )(*[x.astype(_CDTYPE) for x in xs], *w_slabs, sb)
    return out.reshape(N, D, H, W, cout)


# ---------------------------------------------------------------------------
# Kernel 2: trilinear 2x upsample (align_corners=True) as three per-axis matmuls
# ---------------------------------------------------------------------------
def _linear_upsample_matrix(in_size, out_size):
    """nn.Upsample(mode='linear', align_corners=True) as a dense (out, in) matrix."""
    m = np.zeros((out_size, in_size), dtype=np.float32)
    if in_size == 1:
        m[:, 0] = 1.0
        return m
    scale = (in_size - 1) / (out_size - 1)
    for o in range(out_size):
        src = o * scale
        i0 = min(int(np.floor(src)), in_size - 1)
        i1 = min(i0 + 1, in_size - 1)
        t = src - i0
        m[o, i0] += 1.0 - t
        m[o, i1] += t
    return m


_UP_MAT_CACHE = {}


def _up_mat(size):
    if size not in _UP_MAT_CACHE:
        _UP_MAT_CACHE[size] = jnp.asarray(
            _linear_upsample_matrix(size, 2 * size), jnp.float32).astype(_CDTYPE)
    return _UP_MAT_CACHE[size]


def _axis_interp_kernel(a_ref, x_ref, o_ref):
    # a_ref: (Ro, Ri); x_ref: (G, Ri, TC); o_ref: (G, Ro, TC)
    a = a_ref[...]
    for g in range(x_ref.shape[0]):
        y = jax.lax.dot_general(a, x_ref[g],
                                dimension_numbers=(((1,), (0,)), ((), ())),
                                preferred_element_type=jnp.float32)
        o_ref[g] = y.astype(o_ref.dtype)


def _interp_axis(x3, a, *, g_max=8):
    """x3: (B, Ri, Cc); a: (Ro, Ri). Returns (B, Ro, Cc) = a @ x3[b] for every b."""
    B, Ri, Cc = (int(s) for s in x3.shape)
    Ro = int(a.shape[0])

    G = 1
    for g in range(1, g_max + 1):
        if B % g == 0:
            G = g

    budget = _VMEM_LIMIT // 4

    def fits(tc):
        return 2 * G * (Ri + Ro) * max(tc, 128) * 2 + Ro * Ri * 2 <= budget

    TC = Cc
    if not fits(TC):
        divs = [c for c in range(128, Cc + 1, 128) if Cc % c == 0]
        good = [c for c in divs if fits(c)]
        if good:
            TC = max(good)
        elif divs:
            TC = min(divs)

    out = pl.pallas_call(
        _axis_interp_kernel,
        out_shape=jax.ShapeDtypeStruct((B, Ro, Cc), x3.dtype),
        grid_spec=pltpu.PrefetchScalarGridSpec(
            num_scalar_prefetch=0,
            grid=(B // G, Cc // TC),
            in_specs=[pl.BlockSpec((Ro, Ri), lambda b, c: (0, 0)),
                      pl.BlockSpec((G, Ri, TC), lambda b, c: (b, 0, c))],
            out_specs=pl.BlockSpec((G, Ro, TC), lambda b, c: (b, 0, c))),
        compiler_params=pltpu.CompilerParams(
            dimension_semantics=("parallel", "parallel"),
            vmem_limit_bytes=_VMEM_LIMIT),
    )(a, x3)
    return out


def trilinear_upsample2x(x):
    """x: (N,D,H,W,C) -> (N,2D,2H,2W,C), trilinear align_corners=True (separable)."""
    N, D, H, W, C = x.shape
    y = _interp_axis(x.reshape(N * D * H, W, C), _up_mat(W))
    y = y.reshape(N, D, H, 2 * W, C)
    y = _interp_axis(y.reshape(N * D, H, 2 * W * C), _up_mat(H))
    y = y.reshape(N, D, 2 * H, 2 * W, C)
    y = _interp_axis(y.reshape(N, D, 2 * H * 2 * W * C), _up_mat(D))
    return y.reshape(N, 2 * D, 2 * H, 2 * W, C)


# ---------------------------------------------------------------------------
# Parameter init (mirrors UnetDecoder3d.__init__) and forward
# ---------------------------------------------------------------------------
def init_unet_decoder3d(key, encoder_channels, decoder_channels=(256, 128, 64, 32, 16)):
    if len(encoder_channels) == 4:
        decoder_channels = decoder_channels[1:]
    skip_channels = list(encoder_channels[1:]) + [0]
    in_channels = [encoder_channels[0]] + list(decoder_channels[:-1])
    blocks = []
    for ic, sc, dc in zip(in_channels, skip_channels, decoder_channels):
        cin1 = ic + sc
        key, k1, k2, k3, k4 = jax.random.split(key, 5)
        blk = {
            "conv1_w": jax.random.normal(k1, (3, 3, 3, cin1, dc), jnp.float32)
                       * float(np.sqrt(2.0 / (27 * cin1))),
            "conv2_w": jax.random.normal(k2, (3, 3, 3, dc, dc), jnp.float32)
                       * float(np.sqrt(2.0 / (27 * dc))),
        }
        for name, kk in (("bn1", k3), ("bn2", k4)):
            ka, kb, kc, kd = jax.random.split(kk, 4)
            gamma = 1.0 + 0.1 * jax.random.normal(ka, (dc,), jnp.float32)
            beta = 0.1 * jax.random.normal(kb, (dc,), jnp.float32)
            mean = 0.1 * jax.random.normal(kc, (dc,), jnp.float32)
            var = jax.random.uniform(kd, (dc,), jnp.float32, minval=0.5, maxval=1.5)
            s = gamma / jnp.sqrt(var + 1e-5)          # folded eval-mode BatchNorm3d
            blk[f"{name}_scale"] = s
            blk[f"{name}_bias"] = beta - mean * s
        blocks.append(blk)
    return blocks


def unet_decoder3d_forward(blocks, feats):
    """feats: list of NDHWC tensors (feats[0] deepest). Returns list like PyTorch."""
    res = [feats[0]]
    skips = feats[1:]
    for i, blk in enumerate(blocks):
        x = trilinear_upsample2x(res[-1])             # UpSample (nontrainable)
        cu = int(x.shape[-1])
        if i < len(skips):
            # concat fused into conv1: split conv1_w along Cin ([x ; skip] order).
            xs1 = [x, skips[i]]
            ws1 = [blk["conv1_w"][:, :, :, :cu, :], blk["conv1_w"][:, :, :, cu:, :]]
        else:
            xs1 = [x]
            ws1 = [blk["conv1_w"]]
        x = conv3x3x3_bn_relu(xs1, ws1, blk["bn1_scale"], blk["bn1_bias"])
        x = conv3x3x3_bn_relu([x], [blk["conv2_w"]], blk["bn2_scale"], blk["bn2_bias"])
        res.append(x)                                 # attention1/2 == Identity
    return res


# ---------------------------------------------------------------------------
# Pure-JAX reference (for verification only; same bf16 quantization points)
# ---------------------------------------------------------------------------
def _interp_axis_ref(x3, a):
    y = jnp.einsum('oi,bic->boc', a, x3, preferred_element_type=jnp.float32)
    return y.astype(x3.dtype)


def _upsample2x_ref(x):
    N, D, H, W, C = x.shape
    y = _interp_axis_ref(x.reshape(N * D * H, W, C), _up_mat(W))
    y = y.reshape(N, D, H, 2 * W, C)
    y = _interp_axis_ref(y.reshape(N * D, H, 2 * W * C), _up_mat(H))
    y = y.reshape(N, D, 2 * H, 2 * W, C)
    y = _interp_axis_ref(y.reshape(N, D, 2 * H * 2 * W * C), _up_mat(D))
    return y.reshape(N, 2 * D, 2 * H, 2 * W, C)


def _conv_bn_relu_ref(x, w, scale, bias):
    y = jax.lax.conv_general_dilated(
        x, w.astype(x.dtype), window_strides=(1, 1, 1), padding='SAME',
        dimension_numbers=('NDHWC', 'DHWIO', 'NDHWC'),
        preferred_element_type=jnp.float32)
    y = y * scale.astype(jnp.float32) + bias.astype(jnp.float32)
    return jnp.maximum(y, 0.0).astype(x.dtype)


def unet_decoder3d_ref(blocks, feats):
    res = [feats[0]]
    skips = feats[1:]
    for i, blk in enumerate(blocks):
        x = _upsample2x_ref(res[-1])
        if i < len(skips):
            x = jnp.concatenate([x, skips[i]], axis=-1)   # un-fused concat (checks fusion)
        x = _conv_bn_relu_ref(x, blk["conv1_w"], blk["bn1_scale"], blk["bn1_bias"])
        x = _conv_bn_relu_ref(x, blk["conv2_w"], blk["bn2_scale"], blk["bn2_bias"])
        res.append(x)
    return res


# ---------------------------------------------------------------------------
if __name__ == "__main__":
    key = jax.random.PRNGKey(0)
    encoder_channels = (16, 8, 4)      # deepest feature channels, then skip channels
    decoder_channels = (16, 8, 4)
    N, base = 2, 4                     # batch=2, deepest spatial 4^3 -> final 32^3

    kf0, kf1, kf2, kp = jax.random.split(key, 4)
    feats = [
        jax.random.normal(kf0, (N, base, base, base, encoder_channels[0]), jnp.float32),
        jax.random.normal(kf1, (N, 2 * base, 2 * base, 2 * base, encoder_channels[1]),
                          jnp.float32),
        jax.random.normal(kf2, (N, 4 * base, 4 * base, 4 * base, encoder_channels[2]),
                          jnp.float32),
    ]
    feats = [f.astype(_CDTYPE) for f in feats]
    blocks = init_unet_decoder3d(kp, encoder_channels, decoder_channels)

    outs = jax.block_until_ready(unet_decoder3d_forward(blocks, feats))
    refs = jax.block_until_ready(unet_decoder3d_ref(blocks, feats))

    expected_shapes = [
        (N, base, base, base, encoder_channels[0]),
        (N, 2 * base, 2 * base, 2 * base, decoder_channels[0]),
        (N, 4 * base, 4 * base, 4 * base, decoder_channels[1]),
        (N, 8 * base, 8 * base, 8 * base, decoder_channels[2]),
    ]
    assert [tuple(o.shape) for o in outs] == expected_shapes, [o.shape for o in outs]
    for o, r in zip(outs, refs):
        np.testing.assert_allclose(np.asarray(jnp.asarray(o, jnp.float32)),
                                   np.asarray(jnp.asarray(r, jnp.float32)),
                                   rtol=2e-2, atol=2e-2)

    print("KERNEL_OK")
</pallas_src>

<mosaic_0001>
module attributes {stable_mosaic.version = 11 : i64} {
  func.func @_axis_interp_kernel(%arg0: i32, %arg1: i32, %arg2: memref<8x4xbf16, #tpu.memory_space<vmem>>, %arg3: memref<8x4x16xbf16, #tpu.memory_space<vmem>>, %arg4: memref<8x8x16xbf16, #tpu.memory_space<vmem>>) attributes {dimension_semantics = [#tpu.dimension_semantics<parallel>, #tpu.dimension_semantics<parallel>], iteration_bounds = array<i64: 4, 1>, scalar_prefetch = 0 : i64, scratch_operands = 0 : i64, tpu.core_type = #tpu.core_type<tc>, window_params = [{pipeline_mode = #tpu.pipeline_mode<synchronous>, transform_indices = @transform_0, window_bounds = array<i64: 8, 4>}, {transform_indices = @transform_1, window_bounds = array<i64: 8, 4, 16>}, {transform_indices = @transform_2, window_bounds = array<i64: 8, 8, 16>}]} {
    %c0 = arith.constant 0 : index
    %c0_0 = arith.constant 0 : index
    %0 = vector.load %arg2[%c0, %c0_0] : memref<8x4xbf16, #tpu.memory_space<vmem>>, vector<8x4xbf16>
    %c0_1 = arith.constant 0 : index
    %c0_2 = arith.constant 0 : index
    %c0_3 = arith.constant 0 : index
    %1 = vector.load %arg3[%c0_1, %c0_2, %c0_3] : memref<8x4x16xbf16, #tpu.memory_space<vmem>>, vector<1x4x16xbf16>
    %2 = vector.shape_cast %1 : vector<1x4x16xbf16> to vector<4x16xbf16>
    %cst = arith.constant dense<0.000000e+00> : vector<8x16xf32>
    %3 = tpu.matmul %0, %2, %cst {dimension_numbers = #tpu.dot_dimension_numbers<[1], [0], [0], [1], [0, 0, 1, 1], [], []>} : vector<8x4xbf16>, vector<4x16xbf16>, vector<8x16xf32> -> vector<8x16xf32>
    %4 = arith.truncf %3 : vector<8x16xf32> to vector<8x16xbf16>
    %c0_4 = arith.constant 0 : index
    %c0_5 = arith.constant 0 : index
    %c0_6 = arith.constant 0 : index
    %5 = vector.load %arg4[%c0_4, %c0_5, %c0_6] : memref<8x8x16xbf16, #tpu.memory_space<vmem>>, vector<1x8x16xbf16>
    %6 = vector.shape_cast %5 : vector<1x8x16xbf16> to vector<8x16xbf16>
    %7 = vector.shape_cast %4 : vector<8x16xbf16> to vector<1x8x16xbf16>
    tpu.vector_store %arg4[%c0_4, %c0_5, %c0_6], %7 {strides = array<i32>} : memref<8x8x16xbf16, #tpu.memory_space<vmem>>, vector<1x8x16xbf16>,
    %c1 = arith.constant 1 : index
    %c0_7 = arith.constant 0 : index
    %c0_8 = arith.constant 0 : index
    %8 = vector.load %arg3[%c1, %c0_7, %c0_8] : memref<8x4x16xbf16, #tpu.memory_space<vmem>>, vector<1x4x16xbf16>
    %9 = vector.shape_cast %8 : vector<1x4x16xbf16> to vector<4x16xbf16>
    %cst_9 = arith.constant dense<0.000000e+00> : vector<8x16xf32>
    %10 = tpu.matmul %0, %9, %cst_9 {dimension_numbers = #tpu.dot_dimension_numbers<[1], [0], [0], [1], [0, 0, 1, 1], [], []>} : vector<8x4xbf16>, vector<4x16xbf16>, vector<8x16xf32> -> vector<8x16xf32>
    %11 = arith.truncf %10 : vector<8x16xf32> to vector<8x16xbf16>
    %c1_10 = arith.constant 1 : index
    %c0_11 = arith.constant 0 : index
    %c0_12 = arith.constant 0 : index
    %12 = vector.load %arg4[%c1_10, %c0_11, %c0_12] : memref<8x8x16xbf16, #tpu.memory_space<vmem>>, vector<1x8x16xbf16>
    %13 = vector.shape_cast %12 : vector<1x8x16xbf16> to vector<8x16xbf16>
    %14 = vector.shape_cast %11 : vector<8x16xbf16> to vector<1x8x16xbf16>
    tpu.vector_store %arg4[%c1_10, %c0_11, %c0_12], %14 {strides = array<i32>} : memref<8x8x16xbf16, #tpu.memory_space<vmem>>, vector<1x8x16xbf16>,
    %c2 = arith.constant 2 : index
    %c0_13 = arith.constant 0 : index
    %c0_14 = arith.constant 0 : index
    %15 = vector.load %arg3[%c2, %c0_13, %c0_14] : memref<8x4x16xbf16, #tpu.memory_space<vmem>>, vector<1x4x16xbf16>
    %16 = vector.shape_cast %15 : vector<1x4x16xbf16> to vector<4x16xbf16>
    %cst_15 = arith.constant dense<0.000000e+00> : vector<8x16xf32>
    %17 = tpu.matmul %0, %16, %cst_15 {dimension_numbers = #tpu.dot_dimension_numbers<[1], [0], [0], [1], [0, 0, 1, 1], [], []>} : vector<8x4xbf16>, vector<4x16xbf16>, vector<8x16xf32> -> vector<8x16xf32>
    %18 = arith.truncf %17 : vector<8x16xf32> to vector<8x16xbf16>
    %c2_16 = arith.constant 2 : index
    %c0_17 = arith.constant 0 : index
    %c0_18 = arith.constant 0 : index
    %19 = vector.load %arg4[%c2_16, %c0_17, %c0_18] : memref<8x8x16xbf16, #tpu.memory_space<vmem>>, vector<1x8x16xbf16>
    %20 = vector.shape_cast %19 : vector<1x8x16xbf16> to vector<8x16xbf16>
    %21 = vector.shape_cast %18 : vector<8x16xbf16> to vector<1x8x16xbf16>
    tpu.vector_store %arg4[%c2_16, %c0_17, %c0_18], %21 {strides = array<i32>} : memref<8x8x16xbf16, #tpu.memory_space<vmem>>, vector<1x8x16xbf16>,
    %c3 = arith.constant 3 : index
    %c0_19 = arith.constant 0 : index
    %c0_20 = arith.constant 0 : index
    %22 = vector.load %arg3[%c3, %c0_19, %c0_20] : memref<8x4x16xbf16, #tpu.memory_space<vmem>>, vector<1x4x16xbf16>
    %23 = vector.shape_cast %22 : vector<1x4x16xbf16> to vector<4x16xbf16>
    %cst_21 = arith.constant dense<0.000000e+00> : vector<8x16xf32>
    %24 = tpu.matmul %0, %23, %cst_21 {dimension_numbers = #tpu.dot_dimension_numbers<[1], [0], [0], [1], [0, 0, 1, 1], [], []>} : vector<8x4xbf16>, vector<4x16xbf16>, vector<8x16xf32> -> vector<8x16xf32>
    %25 = arith.truncf %24 : vector<8x16xf32> to vector<8x16xbf16>
    %c3_22 = arith.constant 3 : index
    %c0_23 = arith.constant 0 : index
    %c0_24 = arith.constant 0 : index
    %26 = vector.load %arg4[%c3_22, %c0_23, %c0_24] : memref<8x8x16xbf16, #tpu.memory_space<vmem>>, vector<1x8x16xbf16>
    %27 = vector.shape_cast %26 : vector<1x8x16xbf16> to vector<8x16xbf16>
    %28 = vector.shape_cast %25 : vector<8x16xbf16> to vector<1x8x16xbf16>
    tpu.vector_store %arg4[%c3_22, %c0_23, %c0_24], %28 {strides = array<i32>} : memref<8x8x16xbf16, #tpu.memory_space<vmem>>, vector<1x8x16xbf16>,
    %c4 = arith.constant 4 : index
    %c0_25 = arith.constant 0 : index
    %c0_26 = arith.constant 0 : index
    %29 = vector.load %arg3[%c4, %c0_25, %c0_26] : memref<8x4x16xbf16, #tpu.memory_space<vmem>>, vector<1x4x16xbf16>
    %30 = vector.shape_cast %29 : vector<1x4x16xbf16> to vector<4x16xbf16>
    %cst_27 = arith.constant dense<0.000000e+00> : vector<8x16xf32>
    %31 = tpu.matmul %0, %30, %cst_27 {dimension_numbers = #tpu.dot_dimension_numbers<[1], [0], [0], [1], [0, 0, 1, 1], [], []>} : vector<8x4xbf16>, vector<4x16xbf16>, vector<8x16xf32> -> vector<8x16xf32>
    %32 = arith.truncf %31 : vector<8x16xf32> to vector<8x16xbf16>
    %c4_28 = arith.constant 4 : index
    %c0_29 = arith.constant 0 : index
    %c0_30 = arith.constant 0 : index
    %33 = vector.load %arg4[%c4_28, %c0_29, %c0_30] : memref<8x8x16xbf16, #tpu.memory_space<vmem>>, vector<1x8x16xbf16>
    %34 = vector.shape_cast %33 : vector<1x8x16xbf16> to vector<8x16xbf16>
    %35 = vector.shape_cast %32 : vector<8x16xbf16> to vector<1x8x16xbf16>
    tpu.vector_store %arg4[%c4_28, %c0_29, %c0_30], %35 {strides = array<i32>} : memref<8x8x16xbf16, #tpu.memory_space<vmem>>, vector<1x8x16xbf16>,
    %c5 = arith.constant 5 : index
    %c0_31 = arith.constant 0 : index
    %c0_32 = arith.constant 0 : index
    %36 = vector.load %arg3[%c5, %c0_31, %c0_32] : memref<8x4x16xbf16, #tpu.memory_space<vmem>>, vector<1x4x16xbf16>
    %37 = vector.shape_cast %36 : vector<1x4x16xbf16> to vector<4x16xbf16>
    %cst_33 = arith.constant dense<0.000000e+00> : vector<8x16xf32>
    %38 = tpu.matmul %0, %37, %cst_33 {dimension_numbers = #tpu.dot_dimension_numbers<[1], [0], [0], [1], [0, 0, 1, 1], [], []>} : vector<8x4xbf16>, vector<4x16xbf16>, vector<8x16xf32> -> vector<8x16xf32>
    %39 = arith.truncf %38 : vector<8x16xf32> to vector<8x16xbf16>
    %c5_34 = arith.constant 5 : index
    %c0_35 = arith.constant 0 : index
    %c0_36 = arith.constant 0 : index
    %40 = vector.load %arg4[%c5_34, %c0_35, %c0_36] : memref<8x8x16xbf16, #tpu.memory_space<vmem>>, vector<1x8x16xbf16>
    %41 = vector.shape_cast %40 : vector<1x8x16xbf16> to vector<8x16xbf16>
    %42 = vector.shape_cast %39 : vector<8x16xbf16> to vector<1x8x16xbf16>
    tpu.vector_store %arg4[%c5_34, %c0_35, %c0_36], %42 {strides = array<i32>} : memref<8x8x16xbf16, #tpu.memory_space<vmem>>, vector<1x8x16xbf16>,
    %c6 = arith.constant 6 : index
    %c0_37 = arith.constant 0 : index
    %c0_38 = arith.constant 0 : index
    %43 = vector.load %arg3[%c6, %c0_37, %c0_38] : memref<8x4x16xbf16, #tpu.memory_space<vmem>>, vector<1x4x16xbf16>
    %44 = vector.shape_cast %43 : vector<1x4x16xbf16> to vector<4x16xbf16>
    %cst_39 = arith.constant dense<0.000000e+00> : vector<8x16xf32>
    %45 = tpu.matmul %0, %44, %cst_39 {dimension_numbers = #tpu.dot_dimension_numbers<[1], [0], [0], [1], [0, 0, 1, 1], [], []>} : vector<8x4xbf16>, vector<4x16xbf16>, vector<8x16xf32> -> vector<8x16xf32>
    %46 = arith.truncf %45 : vector<8x16xf32> to vector<8x16xbf16>
    %c6_40 = arith.constant 6 : index
    %c0_41 = arith.constant 0 : index
    %c0_42 = arith.constant 0 : index
    %47 = vector.load %arg4[%c6_40, %c0_41, %c0_42] : memref<8x8x16xbf16, #tpu.memory_space<vmem>>, vector<1x8x16xbf16>
    %48 = vector.shape_cast %47 : vector<1x8x16xbf16> to vector<8x16xbf16>
    %49 = vector.shape_cast %46 : vector<8x16xbf16> to vector<1x8x16xbf16>
    tpu.vector_store %arg4[%c6_40, %c0_41, %c0_42], %49 {strides = array<i32>} : memref<8x8x16xbf16, #tpu.memory_space<vmem>>, vector<1x8x16xbf16>,
    %c7 = arith.constant 7 : index
    %c0_43 = arith.constant 0 : index
    %c0_44 = arith.constant 0 : index
    %50 = vector.load %arg3[%c7, %c0_43, %c0_44] : memref<8x4x16xbf16, #tpu.memory_space<vmem>>, vector<1x4x16xbf16>
    %51 = vector.shape_cast %50 : vector<1x4x16xbf16> to vector<4x16xbf16>
    %cst_45 = arith.constant dense<0.000000e+00> : vector<8x16xf32>
    %52 = tpu.matmul %0, %51, %cst_45 {dimension_numbers = #tpu.dot_dimension_numbers<[1], [0], [0], [1], [0, 0, 1, 1], [], []>} : vector<8x4xbf16>, vector<4x16xbf16>, vector<8x16xf32> -> vector<8x16xf32>
    %53 = arith.truncf %52 : vector<8x16xf32> to vector<8x16xbf16>
    %c7_46 = arith.constant 7 : index
    %c0_47 = arith.constant 0 : index
    %c0_48 = arith.constant 0 : index
    %54 = vector.load %arg4[%c7_46, %c0_47, %c0_48] : memref<8x8x16xbf16, #tpu.memory_space<vmem>>, vector<1x8x16xbf16>
    %55 = vector.shape_cast %54 : vector<1x8x16xbf16> to vector<8x16xbf16>
    %56 = vector.shape_cast %53 : vector<8x16xbf16> to vector<1x8x16xbf16>
    tpu.vector_store %arg4[%c7_46, %c0_47, %c0_48], %56 {strides = array<i32>} : memref<8x8x16xbf16, #tpu.memory_space<vmem>>, vector<1x8x16xbf16>,
    return
  }
  func.func @transform_0(%arg0: i32, %arg1: i32) -> (i32, i32) {
    %c0_i32 = arith.constant 0 : i32
    %c0_i32_0 = arith.constant 0 : i32
    %c0_i32_1 = arith.constant 0 : i32
    return %c0_i32, %c0_i32_0 : i32, i32
  }
  func.func @transform_1(%arg0: i32, %arg1: i32) -> (i32, i32, i32) {
    %c0_i32 = arith.constant 0 : i32
    %c0_i32_0 = arith.constant 0 : i32
    return %arg0, %c0_i32, %arg1 : i32, i32, i32
  }
  func.func @transform_2(%arg0: i32, %arg1: i32) -> (i32, i32, i32) {
    %c0_i32 = arith.constant 0 : i32
    %c0_i32_0 = arith.constant 0 : i32
    return %arg0, %c0_i32, %arg1 : i32, i32, i32
  }
}

</mosaic_0001>

<bundles_post_ra>
// kernel: tpu_custom_call.1
= control target key start
LH: loop header
LB: loop body
LE: loop exit
PB: predicated region body
PF: predicated region fallthrough
CT: control target
= control target key end

     0   :  { %s810_s9 = smov 0   ;;  %s812_s10 = smov 0   ;;  %s902_s0 = inlined_call_operand.vmem [shape: bf16[8,4], index: 0, kind: input, shape index: {}]   ;;  %s903_s1 = inlined_call_operand.vmem [shape: bf16[32,4,16], index: 1, kind: input, shape index: {}]   ;;  %s904_s2 = inlined_call_operand.vmem [shape: bf16[32,8,16], index: 2, kind: output, shape index: {}]  }
   0x1   :  { %s814_s11 = smov 0  }
   0x2 LB: > { %s24_s12 = sadd.s32 1, %s787_s10  ;;  %p650_p0 = scmp.ge.s32.totalorder %s791_s11, 1  ;;  %s791_s11 = sphi %s814_s11, %s12_s11   ;;  %s787_s10 = sphi %s812_s10, %s906_s10   ;;  %s783_s9 = sphi %s810_s9, %s905_s9  }
   0x3   : > { %p26_p1 = scmp.ge.s32.totalorder %s24_s12, 4  ;;  %p132_p2 = scmp.lt.s32.totalorder %s791_s11, 5 }
   0x5   : > { %s908_s12 = smov (%p26_p1, %s24_s12), 0  ;;  %p133_p3 = pnand %p650_p0, %p132_p2 }
   0x6   : > { %s651_s13 = sshll.u32 (!%p133_p3), %s783_s9, 3  ;;  %v793_v0 = vmov (!%p133_p3), 0.0   ;;  %vm794_vm0 = vmmov (!%p133_p3), 0   ;;  %vm185_vm1 = vcmask (!%p133_p3), 1041408   ;;  %v179_v7 = vld [vmem:[%s902_s0] sm:$0xf] (!%p133_p3) }
   0x7   : > { %136 = sbr.rel (%p133_p3) target bundleno = 261 (0x105), region = 28  ;;  %695 = vmatprep.subr.bf16.mxu0 (!%p133_p3), %v793_v0  ;;  %701 = vmatprep.subr.bf16.mxu1 (!%p133_p3), %v793_v0  ;;  %p161_p4 = scmp.lt.s32.totalorder (!%p133_p3), %s651_s13, 31  ;;  %vm181_vm2 = vcmask (!%p133_p3), 31744   ;;  %vm230_vm3 = vcmask (!%p133_p3), 125952  }
   0x8   : > { %697 = vmatprep.mubr.msk.bf16.mxu0 (!%p133_p3), %vm794_vm0, %v793_v0  ;;  %703 = vmatprep.mubr.msk.bf16.mxu1 (!%p133_p3), %vm794_vm0, %v793_v0 }
   0xe   : > { %s910_s13 = smov (!%p161_p4, %s651_s13), 31 }
   0xf   : > { %s652_s14 = sshll.u32 %s910_s13, 1  ;;  %s654_s20 = sshll.u32 %s910_s13, 2 }
  0x10   : > { %s836_s17 = scalar_lea.vmem %s903_s1, %s652_s14  ;;  %s875_s23 = scalar_lea.vmem %s904_s2, %s654_s20 }
  0x11   : > { %v180_v1 = vld [vmem:[%s836_s17] sm:$0x3]  ;;  %v656_v2 = vld [vmem:[%s836_s17 + $0x2] sm:$0x3]  ;;  %v659_v3 = vld [vmem:[%s836_s17 + $0x4] sm:$0x3] }
  0x12   : > { %v187_v4 = vsel %vm185_vm1, %v180_v1, 0  ;;  %v235_v5 = vsel %vm185_vm1, %v656_v2, 0  ;;  %v662_v6 = vld [vmem:[%s836_s17 + $0x6] sm:$0x3]  ;;  %v283_v8 = vsel %vm185_vm1, %v659_v3, 0 }
  0x13   : > { %696 = vmatpush3.bf16.msra.mxu0 %v187_v4  ;;  %702 = vmatpush3.bf16.msra.mxu1 %v235_v5  ;;  %v331_v9 = vsel %vm185_vm1, %v662_v6, 0  ;;  %v665_v10 = vld [vmem:[%s836_s17 + $0x8] sm:$0x3]  ;;  %v668_v11 = vld [vmem:[%s836_s17 + $0xa] sm:$0x3] }
  0x14   : > { %707 = vmatprep.subr.bf16.mxu0 %v793_v0  ;;  %713 = vmatprep.subr.bf16.mxu1 %v793_v0  ;;  %v379_v12 = vsel %vm185_vm1, %v665_v10, 0  ;;  %v427_v13 = vsel %vm185_vm1, %v668_v11, 0  ;;  %v671_v14 = vld [vmem:[%s836_s17 + $0xc] sm:$0x3]  ;;  %v674_v15 = vld [vmem:[%s836_s17 + $0xe] sm:$0x3] }
  0x15   : > { %v475_v16 = vsel %vm185_vm1, %v671_v14, 0  ;;  %v523_v17 = vsel %vm185_vm1, %v674_v15, 0 }
  0x16   : > { %698 = vmatmul.mubr.msk.bf16.vlgmr.msra.gmra.mrb[0].mxu0 %vm181_vm2, %v179_v7  ;;  %704 = vmatmul.mubr.msk.bf16.vlgmr.msra.gmra.mrb[0].mxu1 %vm181_vm2, %v179_v7 }
  0x17   : > { %708 = vmatpush3.bf16.msra.mxu0 %v283_v8  ;;  %714 = vmatpush3.bf16.msra.mxu1 %v331_v9 }
  0x18   : > { %709 = vmatprep.mubr.msk.bf16.mxu0 %vm794_vm0, %v793_v0  ;;  %715 = vmatprep.mubr.msk.bf16.mxu1 %vm794_vm0, %v793_v0 }
  0x19   : > { %719 = vmatprep.subr.bf16.mxu0 %v793_v0  ;;  %725 = vmatprep.subr.bf16.mxu1 %v793_v0 }
  0x1e   : > { %710 = vmatmul.mubr.msk.bf16.vlgmr.msra.gmra.mrb[4].mxu0 %vm181_vm2, %v179_v7  ;;  %716 = vmatmul.mubr.msk.bf16.vlgmr.msra.gmra.mrb[4].mxu1 %vm181_vm2, %v179_v7 }
  0x1f   : > { %720 = vmatpush3.bf16.msra.mxu0 %v379_v12  ;;  %726 = vmatpush3.bf16.msra.mxu1 %v427_v13 }
  0x20   : > { %721 = vmatprep.mubr.msk.bf16.mxu0 %vm794_vm0, %v793_v0  ;;  %727 = vmatprep.mubr.msk.bf16.mxu1 %vm794_vm0, %v793_v0 }
  0x21   : > { %731 = vmatprep.subr.bf16.mxu0 %v793_v0  ;;  %737 = vmatprep.subr.bf16.mxu1 %v793_v0 }
  0x26   : > { %722 = vmatmul.mubr.msk.bf16.vlgmr.msra.gmra.mrb[8].mxu0 %vm181_vm2, %v179_v7  ;;  %728 = vmatmul.mubr.msk.bf16.vlgmr.msra.gmra.mrb[8].mxu1 %vm181_vm2, %v179_v7 }
  0x27   : > { %732 = vmatpush3.bf16.msra.mxu0 %v475_v16  ;;  %738 = vmatpush3.bf16.msra.mxu1 %v523_v17 }
  0x28   : > { %733 = vmatprep.mubr.msk.bf16.mxu0 %vm794_vm0, %v793_v0  ;;  %739 = vmatprep.mubr.msk.bf16.mxu1 %vm794_vm0, %v793_v0 }
  0x2e   : > { %734 = vmatmul.mubr.msk.bf16.vlgmr.msra.gmra.mrb[12].mxu0 %vm181_vm2, %v179_v7  ;;  %740 = vmatmul.mubr.msk.bf16.vlgmr.msra.gmra.mrb[12].mxu1 %vm181_vm2, %v179_v7 }
  0xe9   : > { %v223_v18 = vpop.f32.mrb[0].mxu0  ;;  %v271_v19 = vpop.f32.mrb[0].mxu1 }
  0xea   : > { %v229_v20 = vpack.c.bf16 %v223_v18, %v223_v18  ;;  %v277_v21 = vpack.c.bf16 %v271_v19, %v271_v19  ;;  %v699_v22 = vpop.f32.mrb[1].mxu0  ;;  %v705_v23 = vpop.f32.mrb[1].mxu1 }
  0xeb   : > { %v226_v24 = vpop.f32.mrb[2].mxu0  ;;  %v274_v25 = vpop.f32.mrb[2].mxu1 }
  0xec   : > { %231 = vst.msk [vmem:[%s875_s23] sm:$0xf] %vm230_vm3, %v229_v20  ;;  %658 = vst.msk [vmem:[%s875_s23 + $0x4] sm:$0xf] %vm230_vm3, %v277_v21  ;;  %v700_v26 = vpop.f32.mrb[3].mxu0  ;;  %v706_v27 = vpop.f32.mrb[3].mxu1 }
  0xf1   : > { %v319_v28 = vpop.f32.mrb[4].mxu0  ;;  %v367_v29 = vpop.f32.mrb[4].mxu1 }
  0xf2   : > { %v325_v30 = vpack.c.bf16 %v319_v28, %v319_v28  ;;  %v373_v31 = vpack.c.bf16 %v367_v29, %v367_v29  ;;  %v711_v32 = vpop.f32.mrb[5].mxu0  ;;  %v717_v33 = vpop.f32.mrb[5].mxu1 }
  0xf3   : > { %v322_v34 = vpop.f32.mrb[6].mxu0  ;;  %v370_v35 = vpop.f32.mrb[6].mxu1 }
  0xf4   : > { %661 = vst.msk [vmem:[%s875_s23 + $0x8] sm:$0xf] %vm230_vm3, %v325_v30  ;;  %664 = vst.msk [vmem:[%s875_s23 + $0xc] sm:$0xf] %vm230_vm3, %v373_v31  ;;  %v712_v36 = vpop.f32.mrb[7].mxu0  ;;  %v718_v37 = vpop.f32.mrb[7].mxu1 }
  0xf9   : > { %v415_v38 = vpop.f32.mrb[8].mxu0  ;;  %v463_v39 = vpop.f32.mrb[8].mxu1 }
  0xfa   : > { %v421_v40 = vpack.c.bf16 %v415_v38, %v415_v38  ;;  %v469_v41 = vpack.c.bf16 %v463_v39, %v463_v39  ;;  %v723_v42 = vpop.f32.mrb[9].mxu0  ;;  %v729_v43 = vpop.f32.mrb[9].mxu1 }
  0xfb   : > { %v418_v44 = vpop.f32.mrb[10].mxu0  ;;  %v466_v45 = vpop.f32.mrb[10].mxu1 }
  0xfc   : > { %667 = vst.msk [vmem:[%s875_s23 + $0x10] sm:$0xf] %vm230_vm3, %v421_v40  ;;  %670 = vst.msk [vmem:[%s875_s23 + $0x14] sm:$0xf] %vm230_vm3, %v469_v41  ;;  %v724_v46 = vpop.f32.mrb[11].mxu0  ;;  %v730_v47 = vpop.f32.mrb[11].mxu1 }
 0x101   : > { %v511_v48 = vpop.f32.mrb[12].mxu0  ;;  %v559_v49 = vpop.f32.mrb[12].mxu1 }
 0x102   : > { %v517_v50 = vpack.c.bf16 %v511_v48, %v511_v48  ;;  %v565_v51 = vpack.c.bf16 %v559_v49, %v559_v49  ;;  %v735_v52 = vpop.f32.mrb[13].mxu0  ;;  %v741_v53 = vpop.f32.mrb[13].mxu1 }
 0x103   : > { %v514_v54 = vpop.f32.mrb[14].mxu0  ;;  %v562_v55 = vpop.f32.mrb[14].mxu1 }
 0x104   : > { %673 = vst.msk [vmem:[%s875_s23 + $0x18] sm:$0xf] %vm230_vm3, %v517_v50  ;;  %676 = vst.msk [vmem:[%s875_s23 + $0x1c] sm:$0xf] %vm230_vm3, %v565_v51  ;;  %v736_v56 = vpop.f32.mrb[15].mxu0  ;;  %v742_v57 = vpop.f32.mrb[15].mxu1 }
 0x105 PF: > { %s12_s11 = sadd.s32 1, %s791_s11   ;;  %s905_s9 = smov %s787_s10 }
 0x106   : > { %p9_p5 = scmp.ge.s32.totalorder %s12_s11, 6   ;;  %s906_s10 = smov %s908_s12 }
 0x108   :  { %11 = sbr.rel (!%p9_p5) target bundleno = 2 (0x2), region = 72 }

</bundles_post_ra>
